<compile_context>
chip_gen: v7x
topology: tpu7x:2x2x1
jax: 0.10.0
libtpu: 0.0.40
codegen_flags: <defaults>
</compile_context>

<pallas_src>
import functools
import math

import jax
import jax.numpy as jnp
from jax.experimental import pallas as pl
from jax.experimental.pallas import tpu as pltpu

EPS = 1e-5

# splitmix32-style mixing constants, expressed as int32 (two's complement).
_GOLDEN = -1640531527   # 0x9E3779B9
_MIX1 = 0x7FEB352D
_MIX2 = -2073254261     # 0x846CA68B


def _round_up(x, m):
    return (x + m - 1) // m * m


def _residual_kernel(seed_ref, scal_ref, x_ref, w_ref, b_ref, o_ref, *,
                     tile_n, drop_threshold, keep_scale):
    # seed_ref: SMEM (1,)  int32    -- dropout PRNG seed
    # scal_ref: SMEM (2,)  float32  -- [alpha, bias] scalar layernorm params
    # x_ref:    VMEM (tile_n, D) f32
    # w_ref:    VMEM (D, D)          -- sublayer (linear) weight (VMEM-resident)
    # b_ref:    VMEM (1, D) f32      -- sublayer (linear) bias   (VMEM-resident)
    # o_ref:    VMEM (tile_n, D) f32
    x = x_ref[...]
    alpha = scal_ref[0]
    bias = scal_ref[1]
    d = x.shape[-1]

    # --- LayerNorm statistics: two independent lane reductions (overlap on XLU) ---
    s1 = jnp.sum(x, axis=-1, keepdims=True)
    s2 = jnp.sum(x * x, axis=-1, keepdims=True)
    mean = s1 * (1.0 / d)
    var = (s2 - mean * s1) * (1.0 / (d - 1))     # unbiased (torch x.std default)
    var = jnp.maximum(var, 0.0)                  # guard tiny negative / padded rows
    std = jnp.sqrt(var)
    inv = 1.0 / (std + EPS)                      # (tile_n, 1): per-row divide only
    normed = (x - mean) * (alpha * inv) + bias

    # --- sublayer: linear projection on the MXU ---
    y = jnp.dot(normed.astype(w_ref.dtype), w_ref[...],
                preferred_element_type=jnp.float32) + b_ref[...]

    # --- dropout (inverted, training mode): counter-based int32 hash PRNG ---
    if drop_threshold > 0:
        row = (jax.lax.broadcasted_iota(jnp.int32, y.shape, 0)
               + pl.program_id(0) * tile_n)          # global row -> per-tile masks
        col = jax.lax.broadcasted_iota(jnp.int32, y.shape, 1)
        h = row * d + col                            # unique counter per element
        h = h + seed_ref[0] * jnp.int32(_GOLDEN)
        # splitmix-style mixing; logical right shifts emulated via mask.
        h = (h ^ ((h >> 16) & 0xFFFF)) * jnp.int32(_MIX1)
        h = (h ^ ((h >> 15) & 0x1FFFF)) * jnp.int32(_MIX2)
        h = h ^ ((h >> 16) & 0xFFFF)
        u24 = (h >> 8) & 0xFFFFFF                    # uniform integer in [0, 2^24)
        keep = u24 >= drop_threshold                 # integer threshold, no f32 convert
        y = jnp.where(keep, y * keep_scale, 0.0)

    # --- residual add ---
    o_ref[...] = x + y


def residual_connection(x, w, b, alpha, bias, *, dropout_p, seed,
                        tile_n=256, matmul_dtype=jnp.float32):
    """x: (B, S, D).  Returns x + dropout(linear(layernorm(x))) in float32.

    For large D on v6e/v7x, pass matmul_dtype=jnp.bfloat16 to get the bf16 MXU
    rate (accumulation stays f32)."""
    B, S, D = x.shape
    N = B * S

    x2d = x.reshape(N, D)
    if x2d.dtype != jnp.float32:
        x2d = x2d.astype(jnp.float32)
    w_m = w if w.dtype == matmul_dtype else w.astype(matmul_dtype)
    b2d = b.reshape(1, D)
    if b2d.dtype != jnp.float32:
        b2d = b2d.astype(jnp.float32)

    # Row tile: multiple of 8 (sublane), pad N up so the grid divides evenly.
    tile_n = max(8, min(_round_up(int(tile_n), 8), _round_up(N, 8)))
    n_pad = _round_up(N, tile_n)
    if n_pad != N:
        x2d = jnp.pad(x2d, ((0, n_pad - N), (0, 0)))
    grid = (n_pad // tile_n,)

    seed_arr = jnp.asarray([seed], dtype=jnp.int32)
    scal = jnp.asarray([alpha, bias], dtype=jnp.float32)

    drop_threshold = int(round(float(dropout_p) * (1 << 24)))
    keep_scale = 1.0 / (1.0 - float(dropout_p)) if dropout_p > 0.0 else 1.0

    kernel = functools.partial(
        _residual_kernel,
        tile_n=tile_n,
        drop_threshold=drop_threshold,
        keep_scale=keep_scale,
    )

    out2d = pl.pallas_call(
        kernel,
        grid=grid,
        out_shape=jax.ShapeDtypeStruct((n_pad, D), jnp.float32),
        in_specs=[
            pl.BlockSpec(memory_space=pltpu.MemorySpace.SMEM),   # seed
            pl.BlockSpec(memory_space=pltpu.MemorySpace.SMEM),   # [alpha, bias]
            pl.BlockSpec((tile_n, D), lambda i: (i, 0)),         # x row tile
            pl.BlockSpec((D, D), lambda i: (0, 0)),              # w (VMEM-resident)
            pl.BlockSpec((1, D), lambda i: (0, 0)),              # b (VMEM-resident)
        ],
        out_specs=pl.BlockSpec((tile_n, D), lambda i: (i, 0)),
        compiler_params=pltpu.CompilerParams(
            dimension_semantics=("parallel",)),
        cost_estimate=pl.CostEstimate(
            flops=2 * n_pad * D * D,
            transcendentals=0,
            bytes_accessed=(2 * n_pad * D + D * D + D) * 4),
    )(seed_arr, scal, x2d, w_m, b2d)

    if n_pad != N:
        out2d = out2d[:N]
    return out2d.reshape(B, S, D)


def _reference_no_dropout(x, w, b, alpha, bias):
    mean = jnp.mean(x, axis=-1, keepdims=True)
    std = jnp.std(x, axis=-1, keepdims=True, ddof=1)
    normed = alpha * (x - mean) / (std + EPS) + bias
    y = jnp.einsum("bsd,de->bse", normed, w) + b
    return x + y


if __name__ == "__main__":
    key = jax.random.PRNGKey(0)
    kx, kw, kb = jax.random.split(key, 3)

    # Small demo shapes; D=128 keeps the hidden dim lane-dense / 128-aligned.
    B, S, D = 2, 8, 128
    x = jax.random.normal(kx, (B, S, D), dtype=jnp.float32)

    # Sublayer = deterministic linear layer (example sublayer for the residual block).
    w = jax.random.normal(kw, (D, D), dtype=jnp.float32) / math.sqrt(D)
    b = jax.random.normal(kb, (D,), dtype=jnp.float32) * 0.1

    # LayerNormalization params (scalars, as in the module __init__).
    alpha = 1.0
    bias = 0.0
    dropout_p = 0.1

    # Main run: training-mode dropout, small row tile to exercise the grid.
    out = residual_connection(x, w, b, alpha, bias,
                              dropout_p=dropout_p, seed=0, tile_n=8)
    jax.block_until_ready(out)
    assert out.shape == (B, S, D) and out.dtype == jnp.float32
    assert bool(jnp.all(jnp.isfinite(out)))

    # Correctness check against pure-JAX reference with dropout disabled.
    out_nodrop = residual_connection(x, w, b, alpha, bias,
                                     dropout_p=0.0, seed=0, tile_n=8)
    ref = _reference_no_dropout(x, w, b, alpha, bias)
    jax.block_until_ready(out_nodrop)
    assert jnp.allclose(out_nodrop, ref, atol=1e-3, rtol=1e-3), "mismatch vs reference"

    print("KERNEL_OK")
</pallas_src>

<mosaic_0001>
module attributes {stable_mosaic.version = 11 : i64} {
  func.func @_residual_kernel(%arg0: i32, %arg1: memref<1xi32, #tpu.memory_space<smem>>, %arg2: memref<2xf32, #tpu.memory_space<smem>>, %arg3: memref<8x128xf32, #tpu.memory_space<vmem>>, %arg4: memref<128x128xf32, #tpu.memory_space<vmem>>, %arg5: memref<1x128xf32, #tpu.memory_space<vmem>>, %arg6: memref<8x128xf32, #tpu.memory_space<vmem>>) attributes {dimension_semantics = [#tpu.dimension_semantics<parallel>], iteration_bounds = array<i64: 2>, scalar_prefetch = 0 : i64, scratch_operands = 0 : i64, tpu.core_type = #tpu.core_type<tc>, window_params = [{transform_indices = @transform_0, window_bounds = array<i64: 1>}, {transform_indices = @transform_1, window_bounds = array<i64: 2>}, {transform_indices = @transform_2, window_bounds = array<i64: 8, 128>}, {pipeline_mode = #tpu.pipeline_mode<synchronous>, transform_indices = @transform_3, window_bounds = array<i64: 128, 128>}, {pipeline_mode = #tpu.pipeline_mode<synchronous>, transform_indices = @transform_4, window_bounds = array<i64: 1, 128>}, {transform_indices = @transform_5, window_bounds = array<i64: 8, 128>}]} {
    %c0 = arith.constant 0 : index
    %c0_0 = arith.constant 0 : index
    %0 = vector.load %arg3[%c0, %c0_0] : memref<8x128xf32, #tpu.memory_space<vmem>>, vector<8x128xf32>
    %c0_1 = arith.constant 0 : index
    %1 = memref.load %arg2[%c0_1] : memref<2xf32, #tpu.memory_space<smem>>
    %c1 = arith.constant 1 : index
    %2 = memref.load %arg2[%c1] : memref<2xf32, #tpu.memory_space<smem>>
    %cst = arith.constant dense<0.000000e+00> : vector<8xf32>
    %3 = vector.multi_reduction <add>, %0, %cst [1] : vector<8x128xf32> to vector<8xf32>
    %4 = vector.shape_cast %3 : vector<8xf32> to vector<8x1xf32>
    %5 = arith.mulf %0, %0 : vector<8x128xf32>
    %cst_2 = arith.constant dense<0.000000e+00> : vector<8xf32>
    %6 = vector.multi_reduction <add>, %5, %cst_2 [1] : vector<8x128xf32> to vector<8xf32>
    %7 = vector.shape_cast %6 : vector<8xf32> to vector<8x1xf32>
    %cst_3 = arith.constant 7.812500e-03 : f32
    %8 = vector.broadcast %cst_3 : f32 to vector<8x1xf32>
    %9 = arith.mulf %4, %8 : vector<8x1xf32>
    %10 = arith.mulf %9, %4 : vector<8x1xf32>
    %11 = arith.subf %7, %10 : vector<8x1xf32>
    %cst_4 = arith.constant 0.00787401571 : f32
    %12 = vector.broadcast %cst_4 : f32 to vector<8x1xf32>
    %13 = arith.mulf %11, %12 : vector<8x1xf32>
    %cst_5 = arith.constant 0.000000e+00 : f32
    %14 = vector.broadcast %cst_5 : f32 to vector<8x1xf32>
    %15 = arith.maximumf %13, %14 : vector<8x1xf32>
    %16 = math.sqrt %15 : vector<8x1xf32>
    %cst_6 = arith.constant 9.99999974E-6 : f32
    %17 = vector.broadcast %cst_6 : f32 to vector<8x1xf32>
    %18 = arith.addf %16, %17 : vector<8x1xf32>
    %cst_7 = arith.constant 1.000000e+00 : f32
    %19 = vector.broadcast %cst_7 : f32 to vector<8x1xf32>
    %20 = arith.divf %19, %18 : vector<8x1xf32>
    %21 = vector.broadcast %9 : vector<8x1xf32> to vector<8x128xf32>
    %22 = arith.subf %0, %21 : vector<8x128xf32>
    %23 = vector.broadcast %1 : f32 to vector<8x1xf32>
    %24 = arith.mulf %23, %20 : vector<8x1xf32>
    %25 = vector.broadcast %24 : vector<8x1xf32> to vector<8x128xf32>
    %26 = arith.mulf %22, %25 : vector<8x128xf32>
    %27 = vector.broadcast %2 : f32 to vector<8x128xf32>
    %28 = arith.addf %26, %27 : vector<8x128xf32>
    %c0_8 = arith.constant 0 : index
    %c0_9 = arith.constant 0 : index
    %29 = vector.load %arg4[%c0_8, %c0_9] : memref<128x128xf32, #tpu.memory_space<vmem>>, vector<128x128xf32>
    %cst_10 = arith.constant dense<0.000000e+00> : vector<8x128xf32>
    %30 = tpu.matmul %28, %29, %cst_10 {dimension_numbers = #tpu.dot_dimension_numbers<[1], [0], [0], [1], [0, 0, 1, 1], [], []>} : vector<8x128xf32>, vector<128x128xf32>, vector<8x128xf32> -> vector<8x128xf32>
    %c0_11 = arith.constant 0 : index
    %c0_12 = arith.constant 0 : index
    %31 = vector.load %arg5[%c0_11, %c0_12] : memref<1x128xf32, #tpu.memory_space<vmem>>, vector<1x128xf32>
    %32 = vector.broadcast %31 : vector<1x128xf32> to vector<8x128xf32>
    %33 = arith.addf %30, %32 : vector<8x128xf32>
    %34 = tpu.iota {dimensions = array<i32: 0>} : vector<8x128xi32>
    %c8_i32 = arith.constant 8 : i32
    %35 = arith.muli %arg0, %c8_i32 : i32
    %36 = vector.broadcast %35 : i32 to vector<8x128xi32>
    %37 = arith.addi %34, %36 : vector<8x128xi32>
    %38 = tpu.iota {dimensions = array<i32: 1>} : vector<8x128xi32>
    %c128_i32 = arith.constant 128 : i32
    %39 = vector.broadcast %c128_i32 : i32 to vector<8x128xi32>
    %40 = arith.muli %37, %39 : vector<8x128xi32>
    %41 = arith.addi %40, %38 : vector<8x128xi32>
    %c0_13 = arith.constant 0 : index
    %42 = memref.load %arg1[%c0_13] : memref<1xi32, #tpu.memory_space<smem>>
    %c-1640531527_i32 = arith.constant -1640531527 : i32
    %43 = arith.muli %42, %c-1640531527_i32 : i32
    %44 = vector.broadcast %43 : i32 to vector<8x128xi32>
    %45 = arith.addi %41, %44 : vector<8x128xi32>
    %c16_i32 = arith.constant 16 : i32
    %46 = vector.broadcast %c16_i32 : i32 to vector<8x128xi32>
    %47 = arith.shrsi %45, %46 : vector<8x128xi32>
    %c65535_i32 = arith.constant 65535 : i32
    %48 = vector.broadcast %c65535_i32 : i32 to vector<8x128xi32>
    %49 = arith.andi %47, %48 : vector<8x128xi32>
    %50 = arith.xori %45, %49 : vector<8x128xi32>
    %c2146121005_i32 = arith.constant 2146121005 : i32
    %51 = vector.broadcast %c2146121005_i32 : i32 to vector<8x128xi32>
    %52 = arith.muli %50, %51 : vector<8x128xi32>
    %c15_i32 = arith.constant 15 : i32
    %53 = vector.broadcast %c15_i32 : i32 to vector<8x128xi32>
    %54 = arith.shrsi %52, %53 : vector<8x128xi32>
    %c131071_i32 = arith.constant 131071 : i32
    %55 = vector.broadcast %c131071_i32 : i32 to vector<8x128xi32>
    %56 = arith.andi %54, %55 : vector<8x128xi32>
    %57 = arith.xori %52, %56 : vector<8x128xi32>
    %c-2073254261_i32 = arith.constant -2073254261 : i32
    %58 = vector.broadcast %c-2073254261_i32 : i32 to vector<8x128xi32>
    %59 = arith.muli %57, %58 : vector<8x128xi32>
    %c16_i32_14 = arith.constant 16 : i32
    %60 = vector.broadcast %c16_i32_14 : i32 to vector<8x128xi32>
    %61 = arith.shrsi %59, %60 : vector<8x128xi32>
    %c65535_i32_15 = arith.constant 65535 : i32
    %62 = vector.broadcast %c65535_i32_15 : i32 to vector<8x128xi32>
    %63 = arith.andi %61, %62 : vector<8x128xi32>
    %64 = arith.xori %59, %63 : vector<8x128xi32>
    %c8_i32_16 = arith.constant 8 : i32
    %65 = vector.broadcast %c8_i32_16 : i32 to vector<8x128xi32>
    %66 = arith.shrsi %64, %65 : vector<8x128xi32>
    %c16777215_i32 = arith.constant 16777215 : i32
    %67 = vector.broadcast %c16777215_i32 : i32 to vector<8x128xi32>
    %68 = arith.andi %66, %67 : vector<8x128xi32>
    %c1677722_i32 = arith.constant 1677722 : i32
    %69 = vector.broadcast %c1677722_i32 : i32 to vector<8x128xi32>
    %70 = arith.cmpi sge, %68, %69 : vector<8x128xi32>
    %cst_17 = arith.constant 1.11111116 : f32
    %71 = vector.broadcast %cst_17 : f32 to vector<8x128xf32>
    %72 = arith.mulf %33, %71 : vector<8x128xf32>
    %cst_18 = arith.constant 0.000000e+00 : f32
    %73 = vector.broadcast %cst_18 : f32 to vector<8x128xf32>
    %74 = arith.select %70, %72, %73 : vector<8x128xi1>, vector<8x128xf32>
    %75 = arith.addf %0, %74 : vector<8x128xf32>
    %c0_19 = arith.constant 0 : index
    %c0_20 = arith.constant 0 : index
    %76 = vector.load %arg6[%c0_19, %c0_20] : memref<8x128xf32, #tpu.memory_space<vmem>>, vector<8x128xf32>
    tpu.vector_store %arg6[%c0_19, %c0_20], %75 {strides = array<i32>} : memref<8x128xf32, #tpu.memory_space<vmem>>, vector<8x128xf32>,
    return
  }
  func.func @transform_0(%arg0: i32) -> i32 {
    %c0_i32 = arith.constant 0 : i32
    %c0_i32_0 = arith.constant 0 : i32
    return %c0_i32 : i32
  }
  func.func @transform_1(%arg0: i32) -> i32 {
    %c0_i32 = arith.constant 0 : i32
    %c0_i32_0 = arith.constant 0 : i32
    return %c0_i32 : i32
  }
  func.func @transform_2(%arg0: i32) -> (i32, i32) {
    %c0_i32 = arith.constant 0 : i32
    %c0_i32_0 = arith.constant 0 : i32
    return %arg0, %c0_i32 : i32, i32
  }
  func.func @transform_3(%arg0: i32) -> (i32, i32) {
    %c0_i32 = arith.constant 0 : i32
    %c0_i32_0 = arith.constant 0 : i32
    %c0_i32_1 = arith.constant 0 : i32
    return %c0_i32, %c0_i32_0 : i32, i32
  }
  func.func @transform_4(%arg0: i32) -> (i32, i32) {
    %c0_i32 = arith.constant 0 : i32
    %c0_i32_0 = arith.constant 0 : i32
    %c0_i32_1 = arith.constant 0 : i32
    return %c0_i32, %c0_i32_0 : i32, i32
  }
  func.func @transform_5(%arg0: i32) -> (i32, i32) {
    %c0_i32 = arith.constant 0 : i32
    %c0_i32_0 = arith.constant 0 : i32
    return %arg0, %c0_i32 : i32, i32
  }
}

</mosaic_0001>

<bundles_post_ra>
// kernel: tpu_custom_call.1
= control target key start
LH: loop header
LB: loop body
LE: loop exit
PB: predicated region body
PF: predicated region fallthrough
CT: control target
= control target key end

     0   :  { %s1124_s0 = inlined_call_operand.<no memory space> [shape: s32[1], index: 0, kind: input, shape index: {}]   ;;  %s1125_s1 = inlined_call_operand.vmem [shape: f32[2], index: 1, kind: input, shape index: {}]   ;;  %s1126_s2 = inlined_call_operand.hbm [shape: f32[16,128], index: 2, kind: input, shape index: {}]   ;;  %s1127_s3 = inlined_call_operand.hbm [shape: f32[128,128], index: 3, kind: input, shape index: {}]   ;;  %s1128_s4 = inlined_call_operand.vmem [shape: f32[1,128], index: 4, kind: input, shape index: {}]   ;;  %s1129_s5 = inlined_call_operand.hbm [shape: f32[16,128], index: 5, kind: output, shape index: {}]  }
   0x1   :  { %10 = sst [smem:[#allocation2]] %s1124_s0 }
   0x2   :  { %11 = vsyncpa [#allocation6], 0 }
   0x3   :  { %12 = vsyncpa [#allocation4], 0 }
   0x4   :  { %14 = vsyncpa [#allocation4 + $0x1], 0 }
   0x5   :  { %15 = vsyncpa [#allocation9], 0 }
   0x6   :  { %16 = vsyncpa [#allocation5], 0 }
   0x7   :  { %18 = vsyncpa [#allocation5 + $0x1], 0  ;;  %s895_s20 = smov 0   ;;  %s897_s21 = smov 0  }
   0x8   :  { %s899_s22 = smov 0   ;;  %s901_s23 = smov 0  }
   0x9 LB: > { %s916_s0 = sadd.s32 4294967295, %s851_s23   ;;  %s529_s24 = sadd.s32 4294967294, %s851_s23   ;;  %s851_s23 = sphi %s901_s23, %s1151_s23   ;;  %s847_s22 = sphi %s899_s22, %s1150_s22   ;;  %s843_s21 = sphi %s897_s21, %s1149_s21   ;;  %s839_s20 = sphi %s895_s20, %s1148_s20  }
   0xa   : > { %p86_p0 = scmp.ne.s32.totalorder %s843_s21, %s839_s20  ;;  %p1130_p1 = scmp.eq.s32.totalorder %s916_s0, 0 }
   0xb   : > { %p158_p3 = scmp.eq.s32.totalorder %s529_s24, 1  ;;  %p530_p5 = scmp.ge.s32.totalorder %s851_s23, 1 }
   0xc   : > { %p925_p4 = por %p1130_p1, %p86_p0  ;;  %p165_p7 = scmp.lt.s32.totalorder %s851_s23, 3 }
   0xd   : > { %p930_p6 = por %p158_p3, %p86_p0  ;;  %s181_s29 = sshll.u32 %s1125_s1, 4  ;;  %s182_s29 = int_to_ptr.vmem [resolvable:$true] %s181_s29 }
   0xe   : > { %s1133_s25 = scalar_select %p925_p4, 1, 0 }
   0xf   : > { %s1134_s26 = scalar_select %p930_p6, 1, 0 }
  0x10   : > { %p938_p8 = pnand %p530_p5, %p165_p7  ;;  %s853_s6 = smov [#allocation8]  }
  0x11   : > { %s191_s7 = sshll.u32 %s853_s6, 4  ;;  %s704_s9 = scalar_lea.vmem %s182_s29, 16  ;;  %s951_s7 = int_to_ptr.vmem [resolvable:$true] %s191_s7 }
  0x12   : > { %p640_p10 = pneg %p938_p8  ;;  %p705_p12 = scmp.ne.s32.totalorder %s182_s29, %s704_s9 }
  0x13   : > { %p712_p5 = scmp.lt.s32.totalorder %s182_s29, %s182_s29  ;;  %p713_p7 = scmp.lt.s32.totalorder %s704_s9, %s704_s9 }
  0x14   : > { %p947_p11 = pnand %p640_p10, %p1130_p1 }
  0x15   : > { %p714_p9 = por %p713_p7, %p712_p5 }
  0x16   : > { %p706_p13 = pneg %p947_p11 }
  0x18   : > { %p707_p0 = pnand %p706_p13, %p705_p12 }
  0x1a   : > { %p708_p3 = pneg %p707_p0 }
  0x1c   : > { %p715_p2 = pnand %p714_p9, %p708_p3 }
  0x1e   : > { %718 = shalt.err (!%p715_p2)
}
  0x1f   : > { %s854_s10 = smov [#allocation3]   ;;  %s719_s13 = scalar_lea.hbm %s1127_s3, 2048 }
  0x20   : > { %643 = dma.vmem_to_smem (!%p947_p11), %s182_s29, 16, %s854_s10, [#allocation6]  }
  0x21   : > { %p720_p10 = scmp.ne.s32.totalorder %s1127_s3, %s719_s13  ;;  %p726_p2 = scmp.lt.u32.totalorder %s719_s13, %s1127_s3 }
  0x23   : > { %p722_p12 = pnand %p720_p10, %p706_p13 }
  0x25   : > { %p723_p0 = pneg %p722_p12 }
  0x27   : > { %p728_p9 = pnand %p726_p2, %p723_p0 }
  0x29   : > { %731 = shalt.err (!%p728_p9)
}
  0x2a   : > { %s732_s18 = scalar_lea.vmem %s951_s7, 2048  ;;  %p740_p1 = scmp.lt.s32.totalorder %s951_s7, %s951_s7 }
  0x2b   : > { %p733_p3 = scmp.ne.s32.totalorder %s951_s7, %s732_s18  ;;  %p741_p10 = scmp.lt.s32.totalorder %s732_s18, %s732_s18 }
  0x2d   : > { %p735_p5 = pnand %p733_p3, %p706_p13  ;;  %p742_p12 = por %p741_p10, %p740_p1 }
  0x2f   : > { %p736_p7 = pneg %p735_p5 }
  0x31   : > { %p743_p6 = pnand %p742_p12, %p736_p7 }
  0x33   : > { %746 = shalt.err (!%p743_p6)
}
  0x34   : > { %s855_s19 = smov 128   ;;  %s856_s24 = smov 8  }
  0x35   : > { %646 = dma.hbm_to_vmem [thread:$0]  (!%p947_p11), %s1127_s3, 2048, %s951_s7, [#allocation9], %s855_s19, %s855_s19, %s856_s24  }
  0x36   : > { %s986_s29 = sadd.s32 1, %s851_s23   ;;  %s73_s6 = sadd.s32 1, %s847_s22 }
  0x37   : > { %s70_s9 = ssub.s32 %s851_s23, %s986_s29  ;;  %p80_p1 = scmp.ne.s32.totalorder %s847_s22, %s843_s21 }
  0x38   : > { %p71_p6 = scmp.eq.s32.totalorder %s70_s9, 0  ;;  %p81_p13 = scmp.eq.s32.totalorder %s851_s23, 0 }
  0x39   : > { %p1137_p0 = scmp.eq.s32.totalorder %s916_s0, 1  ;;  %p657_p9 = scmp.lt.s32.totalorder %s851_s23, 2 }
  0x3a   : > { %s1002_s11 = scalar_select %p71_p6, %s847_s22, %s73_s6  }
  0x3b   : > { %p996_p2 = por %p1137_p0, %p80_p1  ;;  %p82_p3 = por %p81_p13, %p80_p1 }
  0x3c   : > { %s208_s8 = sand.u32 1, %s847_s22   ;;  %s535_s7 = sshll.u32 %s851_s23, 7 }
  0x3d   : > { %s1138_s10 = scalar_select %p996_p2, 1, 0 }
  0x3e   : > { %s534_s12 = sshll.u32 %s208_s8, 3  ;;  %s1009_s15 = scalar_lea.hbm %s1126_s2, %s535_s7 }
  0x3f   : > { %s212_s16 = scalar_lea.vmem [#allocation7], %s534_s12  ;;  %p1013_p11 = pnand %p657_p9, %p82_p3 }
  0x40   : > { %s219_s17 = sshll.u32 %s212_s16, 4  ;;  %s209_s19 = scalar_lea.sflag [#allocation4], %s208_s8  ;;  %s1011_s17 = int_to_ptr.vmem [resolvable:$true] %s219_s17 }
  0x41   : > { %s747_s24 = scalar_lea.hbm %s1009_s15, 128  ;;  %p749_p7 = pneg %p1013_p11 }
  0x42   : > { %p748_p5 = scmp.ne.s32.totalorder %s1009_s15, %s747_s24  ;;  %s752_s6 = scalar_lea.hbm %s1126_s2, 256 }
  0x43   : > { %p753_p1 = scmp.lt.u32.totalorder %s1009_s15, %s1126_s2  ;;  %p754_p6 = scmp.lt.u32.totalorder %s752_s6, %s747_s24 }
  0x44   : > { %p750_p10 = pnand %p749_p7, %p748_p5  ;;  %p756_p0 = scmp.lt.u32.totalorder %s747_s24, %s1009_s15 }
  0x45   : > { %p755_p13 = por %p754_p6, %p753_p1 }
  0x46   : > { %p751_p12 = pneg %p750_p10 }
  0x47   : > { %p757_p9 = por %p756_p0, %p755_p13 }
  0x49   : > { %p758_p3 = pnand %p757_p9, %p751_p12 }
  0x4b   : > { %761 = shalt.err (!%p758_p3)
}
  0x4c   : > { %s762_s8 = scalar_lea.vmem %s1011_s17, 128  ;;  %s857_s7 = smov [#allocation7]  }
  0x4d   : > { %p763_p5 = scmp.ne.s32.totalorder %s1011_s17, %s762_s8  ;;  %s767_s13 = sshll.u32 %s857_s7, 4  ;;  %s768_s13 = int_to_ptr.vmem [resolvable:$false] %s767_s13 }
  0x4e   : > { %s769_s14 = scalar_lea.vmem %s768_s13, 256  ;;  %p770_p4 = scmp.lt.s32.totalorder %s1011_s17, %s768_s13 }
  0x4f   : > { %p765_p10 = pnand %p763_p5, %p749_p7  ;;  %p771_p1 = scmp.lt.s32.totalorder %s769_s14, %s762_s8 }
  0x51   : > { %p766_p2 = pneg %p765_p10  ;;  %p772_p6 = por %p771_p1, %p770_p4 }
  0x53   : > { %p773_p13 = pnand %p772_p6, %p766_p2 }
  0x55   : > { %776 = shalt.err (!%p773_p13)
}
  0x56   : > { %650 = dma.hbm_to_vmem [thread:$0]  (!%p1013_p11), %s1009_s15, 128, %s1011_s17, %s209_s19  }
  0x57   : > { %228 = sbr.rel (%p938_p8) target bundleno = 524 (0x20c), region = 40  ;;  %p1140_p7 = scmp.eq.s32.totalorder (!%p938_p8), %s916_s0, 0 }
  0x5e   : > { %822 = dma.done.wait (%p1140_p7), [#allocation6], 16   ;;  %p1141_p12 = pmov %p1140_p7 }
  0x5f   : > { %s1049_s16 = sand.u32 1, %s843_s21   ;;  %p1142_p4 = scmp.ne.s32.totalorder %s1133_s25, 0 }
  0x60   : > { %824 = vsyncadd (%p1141_p12), [#allocation6], 4294967280  ;;  %s538_s18 = sshll.u32 %s1049_s16, 3  ;;  %s235_s24 = scalar_lea.sflag [#allocation4], %s1049_s16 }
  0x61   : > { %s238_s15 = scalar_lea.vmem [#allocation7], %s538_s18 }
  0x62   : > { %826 = dma.done.wait (%p1142_p4), %s235_s24, 128  }
  0x63   : > { %828 = vsyncadd (%p1142_p4), %s235_s24, 4294967168  ;;  %p1143_p8 = pmov %p1140_p7 }
  0x64   : > { %p1144_p2 = pmov %p1140_p7 }
  0x65   : > { %830 = dma.done.wait (%p1143_p8), [#allocation9], 2048  }
  0x66   : > { %832 = vsyncadd (%p1144_p2), [#allocation9], 4294965248 }
  0x67   : > { %247 = sfence }
  0x68   : > { %v1063_v0 = vld [vmem:[%s238_s15] sm:$0xff]  ;;  %v299_v2 = vld [vmem:[#allocation8] sm:$0xff]  ;;  %v300_v3 = vld [vmem:[#allocation8 + $0x8] sm:$0xff]  ;;  %v858_v5 = vmov 0.0|0.0   ;;  %vm859_vm0 = vmmov 0   ;;  %v860_v17 = vmov 0.0   ;;  %v392_v48 = vlaneseq }
  0x69   : > { %273 = vadd.xlane.f32.xlu0 %v1063_v0  ;;  %v275_v1 = vmul.f32 %v1063_v0, %v1063_v0  ;;  %v605_v4 = vpack.c.bf16 %v300_v3, %v299_v2  ;;  %604 = vmatprep.subr.bf16.mxu0 %v858_v5  ;;  %v301_v6 = vld [vmem:[#allocation8 + $0x10] sm:$0xff]  ;;  %v302_v7 = vld [vmem:[#allocation8 + $0x18] sm:$0xff]  ;;  %v303_v9 = vld [vmem:[#allocation8 + $0x20] sm:$0xff]  ;;  %s271_s25 = sld [smem:[#allocation3]]  ;;  %s541_s30 = sld [smem:[#allocation3 + $0x1]] }
  0x6a   : > { %v608_v8 = vpack.c.bf16 %v302_v7, %v301_v6  ;;  %v304_v10 = vld [vmem:[#allocation8 + $0x28] sm:$0xff]  ;;  %v305_v12 = vld [vmem:[#allocation8 + $0x30] sm:$0xff]  ;;  %v306_v13 = vld [vmem:[#allocation8 + $0x38] sm:$0xff]  ;;  %601 = vmatprep.mubr.msk.f32.mxu0 %vm859_vm0, %v860_v17  ;;  %s543_s17 = sshll.u32 %s916_s0, 3  ;;  %v393_v49 = vshrl.u32 %v392_v48, 7  ;;  %s401_s19 = sld [smem:[#allocation2]] }
  0x6b   : > { %606 = vmatpush3.bf16.msra.mxu0 %v605_v4  ;;  %v611_v11 = vpack.c.bf16 %v304_v10, %v303_v9  ;;  %v614_v14 = vpack.c.bf16 %v306_v13, %v305_v12  ;;  %v307_v15 = vld [vmem:[#allocation8 + $0x40] sm:$0xff]  ;;  %v308_v16 = vld [vmem:[#allocation8 + $0x48] sm:$0xff]  ;;  %v309_v19 = vld [vmem:[#allocation8 + $0x50] sm:$0xff]  ;;  %v395_v50 = vstv %s543_s17  ;;  %v398_v52 = vand.u32 127, %v392_v48  ;;  %s549_s9 = sshll.u32 %s916_s0, 7  ;;  %s269_s12 = scalar_lea.vmem [#allocation10], %s538_s18 }
  0x6c   : > { %607 = vmatprep.subr.bf16.mxu0 %v858_v5  ;;  %v617_v18 = vpack.c.bf16 %v308_v16, %v307_v15  ;;  %v310_v20 = vld [vmem:[#allocation8 + $0x58] sm:$0xff]  ;;  %v311_v22 = vld [vmem:[#allocation8 + $0x60] sm:$0xff]  ;;  %v312_v23 = vld [vmem:[#allocation8 + $0x68] sm:$0xff]  ;;  %v396_v51 = vadd.s32 %v395_v50, %v393_v49  ;;  %s437_s8 = sshll.u32 %s269_s12, 4  ;;  %s1080_s14 = scalar_lea.hbm %s1129_s5, %s549_s9  ;;  %s1082_s8 = int_to_ptr.vmem [resolvable:$true] %s437_s8 }
  0x6d   : > { %276 = vadd.xlane.f32.xlu0 %v275_v1  ;;  %v620_v21 = vpack.c.bf16 %v310_v20, %v309_v19  ;;  %v623_v24 = vpack.c.bf16 %v312_v23, %v311_v22  ;;  %v313_v25 = vld [vmem:[#allocation8 + $0x70] sm:$0xff]  ;;  %v314_v26 = vld [vmem:[#allocation8 + $0x78] sm:$0xff]  ;;  %s424_s24 = scalar_lea.sflag [#allocation5], %s1049_s16  ;;  %s777_s15 = scalar_lea.vmem %s1082_s8, 128 }
  0x6e   : > { %v626_v27 = vpack.c.bf16 %v314_v26, %v313_v25  ;;  %v399_v53 = vmul.u32 128, %v396_v51  ;;  %v542_v2 = vld [vmem:[%s1128_s4] ss:$0 sm:$0xff]  ;;  %p778_p11 = scmp.ne.s32.totalorder %s1082_s8, %s777_s15  ;;  %p1145_p0 = scmp.ne.s32.totalorder %s1138_s10, 0 }
  0x6f   : > { %609 = vmatpush3.bf16.msra.mxu0 %v608_v8  ;;  %v294_v41 = vstv %s271_s25  ;;  %v297_v45 = vstv %s541_s30  ;;  %s861_s0 = smov [#allocation10]  }
  0x70   : > { %610 = vmatprep.subr.bf16.mxu0 %v858_v5  ;;  %s402_s27 = smul.u32 2654435769, %s401_s19  ;;  %v400_v54 = vadd.s32 %v399_v53, %v398_v52  ;;  %p779_p9 = pnand %p778_p11, %p1145_p0 }
  0x71   : > { %s781_s18 = sshll.u32 %s861_s0, 4  ;;  %s782_s18 = int_to_ptr.vmem [resolvable:$false] %s781_s18 }
  0x72   : > { %v403_v55 = vstv %s402_s27  ;;  %p780_p3 = pneg %p779_p9  ;;  %s783_s25 = scalar_lea.vmem %s782_s18, 256 }
  0x73   : > { %612 = vmatpush3.bf16.msra.mxu0 %v611_v11  ;;  %v404_v56 = vadd.s32 %v403_v55, %v400_v54  ;;  %p784_p5 = scmp.lt.s32.totalorder %s1082_s8, %s782_s18  ;;  %p785_p10 = scmp.lt.s32.totalorder %s783_s25, %s777_s15 }
  0x74   : > { %613 = vmatprep.subr.bf16.mxu0 %v858_v5 }
  0x75   : > { %v544_v57 = vshrl.u32 %v404_v56, 16  ;;  %p786_p1 = por %p785_p10, %p784_p5 }
  0x77   : > { %615 = vmatpush3.bf16.msra.mxu0 %v614_v14  ;;  %v407_v58 = vxor.u32 %v544_v57, %v404_v56  ;;  %p787_p6 = pnand %p786_p1, %p780_p3 }
  0x78   : > { %616 = vmatprep.subr.bf16.mxu0 %v858_v5 }
  0x79   : > { %v408_v59 = vmul.u32 2146121005, %v407_v58 }
  0x7b   : > { %618 = vmatpush3.bf16.msra.mxu0 %v617_v18  ;;  %v545_v60 = vshrl.u32 %v408_v59, 15 }
  0x7c   : > { %619 = vmatprep.subr.bf16.mxu0 %v858_v5 }
  0x7d   : > { %v411_v61 = vxor.u32 %v545_v60, %v408_v59 }
  0x7f   : > { %621 = vmatpush3.bf16.msra.mxu0 %v620_v21  ;;  %v412_v62 = vmul.u32 2221713035, %v411_v61 }
  0x80   : > { %622 = vmatprep.subr.bf16.mxu0 %v858_v5 }
  0x81   : > { %v546_v63 = vshrl.u32 %v412_v62, 16 }
  0x83   : > { %624 = vmatpush3.bf16.msra.mxu0 %v623_v24  ;;  %v415_v1 = vxor.u32 %v546_v63, %v412_v62 }
  0x84   : > { %625 = vmatprep.subr.bf16.mxu0 %v858_v5 }
  0x85   : > { %v547_v3 = vshrl.u32 %v415_v1, 8 }
  0x87   : > { %627 = vmatpush3.bf16.msra.mxu0 %v626_v27  ;;  %vm418_vm3 = vcmp.ge.s32.totalorder %v547_v3, 1677722 }
  0xf6   : > { %v274_v28 = vpop.xlane.xlu0 %273 }
  0xf7   : > { %v278_v29 = vmul.f32 0.0078125, %v274_v28 }
  0xf9   : > { %v279_v30 = vmul.f32 %v278_v29, %v274_v28  ;;  %v293_v43 = vsub.f32 %v1063_v0, %v278_v29 }
  0xfa   : > { %v277_v31 = vpop.xlane.xlu0 %276 }
  0xfb   : > { %v280_v32 = vsub.f32 %v277_v31, %v279_v30 }
  0xfd   : > { %v281_v33 = vmul.f32 0.007874016, %v280_v32 }
  0xff   : > { %v282_v34 = vmax.f32 %v281_v33, 0.0 }
 0x101   : > { %700 = vrsqrt.f32 %v282_v34  ;;  %vm285_vm1 = vcmp.eq.f32.partialorder %v282_v34, inf  ;;  %v288_v37 = vand.u32 2147483648, %v282_v34  ;;  %vm287_vm2 = vcmp.eq.f32.partialorder %v282_v34, 0.0 }
 0x10b   : > { %v701_v35 = vpop.eup %700 }
 0x10c   : > { %v284_v36 = vmul.f32 %v701_v35, %v282_v34 }
 0x10e   : > { %v286_v38 = vsel %vm285_vm1, %v282_v34, %v284_v36 }
 0x10f   : > { %v289_v39 = vsel %vm287_vm2, %v288_v37, %v286_v38 }
 0x110   : > { %v290_v40 = vadd.f32 1e-05, %v289_v39 }
 0x112   : > { %702 = vrcp.f32 %v290_v40 }
 0x11c   : > { %v703_v42 = vpop.eup %702 }
 0x11d   : > { %v295_v44 = vmul.f32 %v703_v42, %v294_v41 }
 0x11f   : > { %v296_v46 = vmul.f32 %v295_v44, %v293_v43 }
 0x121   : > { %v298_v47 = vadd.f32 %v297_v45, %v296_v46 }
 0x123   : > { %602 = vmatmul.mubr.f32.vlgmr.msra.gmra.mrb[0].mxu0 %v298_v47 }
 0x1f6   : > { %v388_v4 = vpop.f32.mrb[0].mxu0 }
 0x1f7   : > { %v389_v5 = vadd.f32 %v542_v2, %v388_v4  ;;  %v603_v6 = vpop.f32.mrb[1].mxu0 }
 0x1f9   : > { %v419_v7 = vmul.f32 1.1111112, %v389_v5 }
 0x1fb   : > { %v420_v8 = vsel %vm418_vm3, %v419_v7, 0.0 }
 0x1fc   : > { %v421_v9 = vadd.f32 %v420_v8, %v1063_v0 }
 0x1fe   : > { %422 = vst [vmem:[%s269_s12] sm:$0xff] %v421_v9 }
 0x1ff   : > { %790 = shalt.err (!%p787_p6)
}
 0x200   : > { %s791_s16 = scalar_lea.hbm %s1080_s14, 128  ;;  %s795_s19 = scalar_lea.hbm %s1129_s5, 256 }
 0x201   : > { %p792_p13 = scmp.ne.s32.totalorder %s1080_s14, %s791_s16  ;;  %p796_p4 = scmp.lt.u32.totalorder %s1080_s14, %s1129_s5 }
 0x202   : > { %p797_p8 = scmp.lt.u32.totalorder %s795_s19, %s791_s16  ;;  %p799_p11 = scmp.lt.u32.totalorder %s791_s16, %s1080_s14 }
 0x203   : > { %p793_p7 = pnand %p792_p13, %p1145_p0 }
 0x204   : > { %p798_p2 = por %p797_p8, %p796_p4 }
 0x205   : > { %p794_p12 = pneg %p793_p7 }
 0x206   : > { %p800_p9 = por %p799_p11, %p798_p2 }
 0x208   : > { %p801_p3 = pnand %p800_p9, %p794_p12 }
 0x20a   : > { %804 = shalt.err (!%p801_p3)
}
 0x20b   : > { %638 = dma.vmem_to_hbm [thread:$0]  (%p1145_p0), %s1082_s8, 128, %s1080_s14, %s424_s24  }
 0x20c PF: > { %s449_s6 = sand.u32 1, %s839_s20   ;;  %p1146_p5 = scmp.ne.s32.totalorder %s1134_s26, 0 }
 0x20d   : > { %p1147_p10 = scmp.ge.s32.totalorder %s851_s23, 2  ;;  %s450_s9 = scalar_lea.sflag [#allocation5], %s449_s6 }
 0x20f   : > { %p652_p1 = pnand %p1147_p10, %p1146_p5 }
 0x211   : > { %834 = dma.done.wait (!%p652_p1), %s450_s9, 128  }
 0x212   : > { %836 = vsyncadd (!%p652_p1), %s450_s9, 4294967168  ;;  %p21_p6 = scmp.ge.s32.totalorder %s986_s29, 4   ;;  %s1148_s20 = smov %s843_s21 }
 0x213   : > { %s1149_s21 = smov %s847_s22  ;;  %s1150_s22 = smov %s1002_s11 }
 0x214   : > { %s1151_s23 = smov %s986_s29  ;;  %23 = sbr.rel (!%p21_p6) target bundleno = 9 (0x9), region = 94 }
 0x21b   :  { %455 = vsyncpa [#allocation4], 1 }
 0x21c   :  { %457 = vsyncpa [#allocation4 + $0x1], 1 }
 0x21d   :  { %458 = vsyncpa [#allocation9], 1 }
 0x21e   :  { %459 = vsyncpa [#allocation5], 1 }
 0x21f   :  { %461 = vsyncpa [#allocation5 + $0x1], 1 }
 0x220   :  { %462 = vsyncpa [#allocation6], 1 }
 0x221   :  { %464 = vsyncpa [#allocation6 + $0x1], 1 }

</bundles_post_ra>
